<compile_context>
chip_gen: v6e
topology: v6e:2x2x1
jax: 0.10.0
libtpu: 0.0.40
codegen_flags: <defaults>
</compile_context>

<pallas_src>
import functools

import jax
import jax.numpy as jnp
from jax.experimental import pallas as pl
from jax.experimental.pallas import tpu as pltpu


def _round_up(v, m):
    return (v + m - 1) // m * m


def _vmem_limit_bytes(default_bytes=32 * 1024 * 1024):
    """Generation-aware scoped-VMEM limit: ~3/4 of physical, capped at 100 MiB.
    (~96 MiB on v5e/v6e with 128 MiB physical, ~48 MiB on v7x with 64 MiB.)"""
    try:
        info = pltpu.get_tpu_info()
        for name in ("vmem_capacity_bytes", "vmem_size_bytes", "vmem_bytes"):
            cap = getattr(info, name, None)
            if cap:
                return int(min(cap * 3 // 4, 100 * 1024 * 1024))
    except Exception:
        pass
    return default_bytes


def _mhsa_kernel(x_ref, wqkv_ref, bqkv_ref, wp_ref, bproj_ref, o_ref,
                 *, num_heads, head_dim):
    x = x_ref[0]                                        # (N, C_pad) bf16
    N, C_pad = x.shape

    # QKV for ALL heads in three full GEMMs (bf16 MXU operands, f32 accumulate).
    # The softmax scale is already folded into wqkv_ref[0] / bqkv_ref[0].
    q = jnp.dot(x, wqkv_ref[0], preferred_element_type=jnp.float32) + bqkv_ref[0]
    k = jnp.dot(x, wqkv_ref[1], preferred_element_type=jnp.float32) + bqkv_ref[1]
    v = jnp.dot(x, wqkv_ref[2], preferred_element_type=jnp.float32) + bqkv_ref[2]
    k_bf = k.astype(jnp.bfloat16)

    # Lane index used to build per-head masks (exact: just zeroing lanes).
    col = jax.lax.broadcasted_iota(jnp.int32, (N, C_pad), 1)

    # Head-concat accumulated in f32 inside the body (no scratch RMW).
    concat = jnp.zeros((N, C_pad), jnp.float32)

    # TODO(synk): for long sequences add flash-style kv tiling (online softmax)
    # instead of materializing the full (N, N) score matrix.
    for h in range(num_heads):                          # static unroll (H is compile-time)
        lo = h * head_dim
        hi = lo + head_dim
        m = jnp.logical_and(col >= lo, col < hi)

        # Mask q to head h's lanes -> the full-lane contraction against k is
        # exactly this head's q_h @ k_h^T (no per-head slicing / relayout).
        q_h = jnp.where(m, q, 0.0).astype(jnp.bfloat16)
        s = jax.lax.dot_general(
            q_h, k_bf, dimension_numbers=(((1,), (1,)), ((), ())),
            preferred_element_type=jnp.float32)          # (N, N) f32

        # Softmax in f32 with deferred (exact) normalization; attn_drop is identity.
        s = s - jnp.max(s, axis=-1, keepdims=True)
        p = jnp.exp(s)
        l = jnp.sum(p, axis=-1, keepdims=True)           # (N, 1)

        # p_h @ v masked to head h lands the result in head h's lanes of concat.
        v_h = jnp.where(m, v, 0.0).astype(jnp.bfloat16)
        o_h = jnp.dot(p.astype(jnp.bfloat16), v_h,
                      preferred_element_type=jnp.float32)  # (N, C_pad)
        concat = concat + o_h * (1.0 / l)                # normalize on (N, C_pad), not (N, N)

    # Output projection in one GEMM; proj_drop is identity.
    out = jnp.dot(concat.astype(jnp.bfloat16), wp_ref[...],
                  preferred_element_type=jnp.float32)
    o_ref[0] = (out + bproj_ref[...]).astype(o_ref.dtype)


def prepare_attention_params(wqkv, bqkv, wproj, bproj, *, num_heads):
    """One-time parameter prep (hoisted out of the per-call path).
    Inputs in PyTorch nn.Linear (out, in) layout: wqkv (3C, C), bqkv (3C,),
    wproj (C, C), bproj (C,)."""
    C = wproj.shape[0]
    assert C % num_heads == 0
    hd = C // num_heads
    scale = hd ** (-0.5)
    C_pad = _round_up(C, 128)

    w3 = wqkv.reshape(3, C, C)                       # (3, out, in)
    wq = w3[0] * scale                               # fold softmax scale into Wq
    wk, wv = w3[1], w3[2]
    bq, bk, bv = jnp.split(bqkv, 3)
    bq = bq * scale                                  # and into bq

    # (in, out) layout, zero-padded to lane width (exact).
    wqkv_p = jnp.zeros((3, C_pad, C_pad), jnp.bfloat16)
    wqkv_p = wqkv_p.at[0, :C, :C].set(wq.T.astype(jnp.bfloat16))
    wqkv_p = wqkv_p.at[1, :C, :C].set(wk.T.astype(jnp.bfloat16))
    wqkv_p = wqkv_p.at[2, :C, :C].set(wv.T.astype(jnp.bfloat16))

    bqkv_p = jnp.zeros((3, 1, C_pad), jnp.float32)
    bqkv_p = bqkv_p.at[0, 0, :C].set(bq.astype(jnp.float32))
    bqkv_p = bqkv_p.at[1, 0, :C].set(bk.astype(jnp.float32))
    bqkv_p = bqkv_p.at[2, 0, :C].set(bv.astype(jnp.float32))

    wp_p = jnp.zeros((C_pad, C_pad), jnp.bfloat16).at[:C, :C].set(
        wproj.T.astype(jnp.bfloat16))
    bproj_p = jnp.zeros((1, C_pad), jnp.float32).at[0, :C].set(
        bproj.astype(jnp.float32))

    return dict(wqkv=wqkv_p, bqkv=bqkv_p, wproj=wp_p, bproj=bproj_p,
                C=C, C_pad=C_pad, num_heads=num_heads, head_dim=hd)


def attention_forward(x, params):
    """x: (B, N, C); params from prepare_attention_params."""
    B, N, C = x.shape
    C_pad = params["C_pad"]
    assert C == params["C"]
    out_dtype = x.dtype

    # Skip the pad materialization when C is already lane-aligned.
    if C == C_pad:
        x_p = x.astype(jnp.bfloat16)
    else:
        x_p = jnp.zeros((B, N, C_pad), jnp.bfloat16).at[..., :C].set(
            x.astype(jnp.bfloat16))

    kernel = functools.partial(_mhsa_kernel,
                               num_heads=params["num_heads"],
                               head_dim=params["head_dim"])

    out_pad = pl.pallas_call(
        kernel,
        out_shape=jax.ShapeDtypeStruct((B, N, C_pad), out_dtype),
        grid_spec=pltpu.PrefetchScalarGridSpec(
            num_scalar_prefetch=0,
            grid=(B,),
            in_specs=[
                # x: one batch element per grid step.
                pl.BlockSpec((1, N, C_pad), lambda b: (b, 0, 0)),
                # Weights/biases: index_map independent of b -> DMA'd once.
                pl.BlockSpec((3, C_pad, C_pad), lambda b: (0, 0, 0)),   # Wq|Wk|Wv
                pl.BlockSpec((3, 1, C_pad), lambda b: (0, 0, 0)),       # bq|bk|bv
                pl.BlockSpec((C_pad, C_pad), lambda b: (0, 0)),         # Wproj
                pl.BlockSpec((1, C_pad), lambda b: (0, 0)),             # bproj
            ],
            out_specs=pl.BlockSpec((1, N, C_pad), lambda b: (b, 0, 0)),
        ),
        compiler_params=pltpu.CompilerParams(
            dimension_semantics=("parallel",),
            vmem_limit_bytes=_vmem_limit_bytes(),
        ),
    )(x_p, params["wqkv"], params["bqkv"], params["wproj"], params["bproj"])

    return out_pad[..., :C]


def attention_reference(x, wqkv, bqkv, wproj, bproj, *, num_heads):
    """Pure-JAX f32 reference mirroring the PyTorch forward."""
    B, N, C = x.shape
    hd = C // num_heads
    scale = hd ** (-0.5)
    qkv = x @ wqkv.T + bqkv                              # (B, N, 3C)
    qkv = qkv.reshape(B, N, 3, num_heads, hd)
    qkv = jnp.transpose(qkv, (2, 0, 3, 1, 4))            # (3, B, H, N, hd)
    q, k, v = qkv[0], qkv[1], qkv[2]
    attn = jax.nn.softmax(jnp.einsum("bhnd,bhmd->bhnm", q, k) * scale, axis=-1)
    out = jnp.einsum("bhnm,bhmd->bhnd", attn, v)         # (B, H, N, hd)
    out = jnp.transpose(out, (0, 2, 1, 3)).reshape(B, N, C)
    return out @ wproj.T + bproj


if __name__ == "__main__":
    # Small shapes consistent with the module: dim divisible by num_heads=3.
    B, N, C = 2, 8, 48
    num_heads = 3

    key = jax.random.PRNGKey(0)
    kx, kw1, kb1, kw2, kb2 = jax.random.split(key, 5)

    x = jax.random.normal(kx, (B, N, C), dtype=jnp.float32)

    # Deterministic synthetic parameters (trunc_normal-like scale 0.02), PyTorch (out, in) layout.
    wqkv = jax.random.normal(kw1, (3 * C, C), dtype=jnp.float32) * 0.02
    bqkv = jax.random.normal(kb1, (3 * C,), dtype=jnp.float32) * 0.02
    wproj = jax.random.normal(kw2, (C, C), dtype=jnp.float32) * 0.02
    bproj = jax.random.normal(kb2, (C,), dtype=jnp.float32) * 0.02

    params = prepare_attention_params(wqkv, bqkv, wproj, bproj, num_heads=num_heads)

    out = attention_forward(x, params)
    out = jax.block_until_ready(out)

    ref = attention_reference(x, wqkv, bqkv, wproj, bproj, num_heads=num_heads)
    assert out.shape == (B, N, C)
    max_err = jnp.max(jnp.abs(out - ref))
    # bf16 MXU operands -> loosened tolerance vs the f32 reference.
    assert jnp.allclose(out, ref, atol=1e-2, rtol=1e-2), \
        f"mismatch vs reference (max abs err {max_err})"

    print("KERNEL_OK")
</pallas_src>

<mosaic_0001>
module attributes {stable_mosaic.version = 11 : i64} {
  func.func @_mhsa_kernel(%arg0: i32, %arg1: memref<1x8x128xbf16, #tpu.memory_space<vmem>>, %arg2: memref<3x128x128xbf16, #tpu.memory_space<vmem>>, %arg3: memref<3x1x128xf32, #tpu.memory_space<vmem>>, %arg4: memref<128x128xbf16, #tpu.memory_space<vmem>>, %arg5: memref<1x128xf32, #tpu.memory_space<vmem>>, %arg6: memref<1x8x128xf32, #tpu.memory_space<vmem>>) attributes {dimension_semantics = [#tpu.dimension_semantics<parallel>], iteration_bounds = array<i64: 2>, scalar_prefetch = 0 : i64, scratch_operands = 0 : i64, tpu.core_type = #tpu.core_type<tc>, window_params = [{transform_indices = @transform_0, window_bounds = array<i64: 1, 8, 128>}, {pipeline_mode = #tpu.pipeline_mode<synchronous>, transform_indices = @transform_1, window_bounds = array<i64: 3, 128, 128>}, {pipeline_mode = #tpu.pipeline_mode<synchronous>, transform_indices = @transform_2, window_bounds = array<i64: 3, 1, 128>}, {pipeline_mode = #tpu.pipeline_mode<synchronous>, transform_indices = @transform_3, window_bounds = array<i64: 128, 128>}, {pipeline_mode = #tpu.pipeline_mode<synchronous>, transform_indices = @transform_4, window_bounds = array<i64: 1, 128>}, {transform_indices = @transform_5, window_bounds = array<i64: 1, 8, 128>}]} {
    %c0 = arith.constant 0 : index
    %c0_0 = arith.constant 0 : index
    %c0_1 = arith.constant 0 : index
    %0 = vector.load %arg1[%c0, %c0_0, %c0_1] : memref<1x8x128xbf16, #tpu.memory_space<vmem>>, vector<1x8x128xbf16>
    %1 = vector.shape_cast %0 : vector<1x8x128xbf16> to vector<8x128xbf16>
    %c0_2 = arith.constant 0 : index
    %c0_3 = arith.constant 0 : index
    %c0_4 = arith.constant 0 : index
    %2 = vector.load %arg2[%c0_2, %c0_3, %c0_4] : memref<3x128x128xbf16, #tpu.memory_space<vmem>>, vector<1x128x128xbf16>
    %3 = vector.shape_cast %2 : vector<1x128x128xbf16> to vector<128x128xbf16>
    %cst = arith.constant dense<0.000000e+00> : vector<8x128xf32>
    %4 = tpu.matmul %1, %3, %cst {dimension_numbers = #tpu.dot_dimension_numbers<[1], [0], [0], [1], [0, 0, 1, 1], [], []>} : vector<8x128xbf16>, vector<128x128xbf16>, vector<8x128xf32> -> vector<8x128xf32>
    %c0_5 = arith.constant 0 : index
    %c0_6 = arith.constant 0 : index
    %c0_7 = arith.constant 0 : index
    %5 = vector.load %arg3[%c0_5, %c0_6, %c0_7] : memref<3x1x128xf32, #tpu.memory_space<vmem>>, vector<1x1x128xf32>
    %6 = vector.shape_cast %5 : vector<1x1x128xf32> to vector<1x128xf32>
    %7 = vector.broadcast %6 : vector<1x128xf32> to vector<8x128xf32>
    %8 = arith.addf %4, %7 : vector<8x128xf32>
    %c1 = arith.constant 1 : index
    %c0_8 = arith.constant 0 : index
    %c0_9 = arith.constant 0 : index
    %9 = vector.load %arg2[%c1, %c0_8, %c0_9] : memref<3x128x128xbf16, #tpu.memory_space<vmem>>, vector<1x128x128xbf16>
    %10 = vector.shape_cast %9 : vector<1x128x128xbf16> to vector<128x128xbf16>
    %cst_10 = arith.constant dense<0.000000e+00> : vector<8x128xf32>
    %11 = tpu.matmul %1, %10, %cst_10 {dimension_numbers = #tpu.dot_dimension_numbers<[1], [0], [0], [1], [0, 0, 1, 1], [], []>} : vector<8x128xbf16>, vector<128x128xbf16>, vector<8x128xf32> -> vector<8x128xf32>
    %c1_11 = arith.constant 1 : index
    %c0_12 = arith.constant 0 : index
    %c0_13 = arith.constant 0 : index
    %12 = vector.load %arg3[%c1_11, %c0_12, %c0_13] : memref<3x1x128xf32, #tpu.memory_space<vmem>>, vector<1x1x128xf32>
    %13 = vector.shape_cast %12 : vector<1x1x128xf32> to vector<1x128xf32>
    %14 = vector.broadcast %13 : vector<1x128xf32> to vector<8x128xf32>
    %15 = arith.addf %11, %14 : vector<8x128xf32>
    %c2 = arith.constant 2 : index
    %c0_14 = arith.constant 0 : index
    %c0_15 = arith.constant 0 : index
    %16 = vector.load %arg2[%c2, %c0_14, %c0_15] : memref<3x128x128xbf16, #tpu.memory_space<vmem>>, vector<1x128x128xbf16>
    %17 = vector.shape_cast %16 : vector<1x128x128xbf16> to vector<128x128xbf16>
    %cst_16 = arith.constant dense<0.000000e+00> : vector<8x128xf32>
    %18 = tpu.matmul %1, %17, %cst_16 {dimension_numbers = #tpu.dot_dimension_numbers<[1], [0], [0], [1], [0, 0, 1, 1], [], []>} : vector<8x128xbf16>, vector<128x128xbf16>, vector<8x128xf32> -> vector<8x128xf32>
    %c2_17 = arith.constant 2 : index
    %c0_18 = arith.constant 0 : index
    %c0_19 = arith.constant 0 : index
    %19 = vector.load %arg3[%c2_17, %c0_18, %c0_19] : memref<3x1x128xf32, #tpu.memory_space<vmem>>, vector<1x1x128xf32>
    %20 = vector.shape_cast %19 : vector<1x1x128xf32> to vector<1x128xf32>
    %21 = vector.broadcast %20 : vector<1x128xf32> to vector<8x128xf32>
    %22 = arith.addf %18, %21 : vector<8x128xf32>
    %23 = arith.truncf %15 : vector<8x128xf32> to vector<8x128xbf16>
    %24 = tpu.iota {dimensions = array<i32: 1>} : vector<8x128xi32>
    %cst_20 = arith.constant 0.000000e+00 : f32
    %25 = vector.broadcast %cst_20 : f32 to vector<8x128xf32>
    %c0_i32 = arith.constant 0 : i32
    %26 = vector.broadcast %c0_i32 : i32 to vector<8x128xi32>
    %27 = arith.cmpi sge, %24, %26 : vector<8x128xi32>
    %c16_i32 = arith.constant 16 : i32
    %28 = vector.broadcast %c16_i32 : i32 to vector<8x128xi32>
    %29 = arith.cmpi slt, %24, %28 : vector<8x128xi32>
    %30 = arith.andi %27, %29 : vector<8x128xi1>
    %cst_21 = arith.constant 0.000000e+00 : f32
    %31 = vector.broadcast %cst_21 : f32 to vector<8x128xf32>
    %32 = arith.select %30, %8, %31 : vector<8x128xi1>, vector<8x128xf32>
    %33 = arith.truncf %32 : vector<8x128xf32> to vector<8x128xbf16>
    %cst_22 = arith.constant dense<0.000000e+00> : vector<8x8xf32>
    %34 = tpu.matmul %33, %23, %cst_22 {dimension_numbers = #tpu.dot_dimension_numbers<[1], [1], [0], [0], [0, 0, 1, 0], [], []>} : vector<8x128xbf16>, vector<8x128xbf16>, vector<8x8xf32> -> vector<8x8xf32>
    %cst_23 = arith.constant dense<0xFF800000> : vector<8xf32>
    %35 = vector.multi_reduction <maximumf>, %34, %cst_23 [1] : vector<8x8xf32> to vector<8xf32>
    %36 = vector.shape_cast %35 : vector<8xf32> to vector<8x1xf32>
    %37 = vector.broadcast %36 : vector<8x1xf32> to vector<8x8xf32>
    %38 = arith.subf %34, %37 : vector<8x8xf32>
    %39 = math.exp %38 : vector<8x8xf32>
    %cst_24 = arith.constant dense<0.000000e+00> : vector<8xf32>
    %40 = vector.multi_reduction <add>, %39, %cst_24 [1] : vector<8x8xf32> to vector<8xf32>
    %41 = vector.shape_cast %40 : vector<8xf32> to vector<8x1xf32>
    %cst_25 = arith.constant 0.000000e+00 : f32
    %42 = vector.broadcast %cst_25 : f32 to vector<8x128xf32>
    %43 = arith.select %30, %22, %42 : vector<8x128xi1>, vector<8x128xf32>
    %44 = arith.truncf %43 : vector<8x128xf32> to vector<8x128xbf16>
    %45 = arith.truncf %39 : vector<8x8xf32> to vector<8x8xbf16>
    %cst_26 = arith.constant dense<0.000000e+00> : vector<8x128xf32>
    %46 = tpu.matmul %45, %44, %cst_26 {dimension_numbers = #tpu.dot_dimension_numbers<[1], [0], [0], [1], [0, 0, 1, 1], [], []>} : vector<8x8xbf16>, vector<8x128xbf16>, vector<8x128xf32> -> vector<8x128xf32>
    %cst_27 = arith.constant 1.000000e+00 : f32
    %47 = vector.broadcast %cst_27 : f32 to vector<8x1xf32>
    %48 = arith.divf %47, %41 : vector<8x1xf32>
    %49 = vector.broadcast %48 : vector<8x1xf32> to vector<8x128xf32>
    %50 = arith.mulf %46, %49 : vector<8x128xf32>
    %51 = arith.addf %25, %50 : vector<8x128xf32>
    %c16_i32_28 = arith.constant 16 : i32
    %52 = vector.broadcast %c16_i32_28 : i32 to vector<8x128xi32>
    %53 = arith.cmpi sge, %24, %52 : vector<8x128xi32>
    %c32_i32 = arith.constant 32 : i32
    %54 = vector.broadcast %c32_i32 : i32 to vector<8x128xi32>
    %55 = arith.cmpi slt, %24, %54 : vector<8x128xi32>
    %56 = arith.andi %53, %55 : vector<8x128xi1>
    %cst_29 = arith.constant 0.000000e+00 : f32
    %57 = vector.broadcast %cst_29 : f32 to vector<8x128xf32>
    %58 = arith.select %56, %8, %57 : vector<8x128xi1>, vector<8x128xf32>
    %59 = arith.truncf %58 : vector<8x128xf32> to vector<8x128xbf16>
    %cst_30 = arith.constant dense<0.000000e+00> : vector<8x8xf32>
    %60 = tpu.matmul %59, %23, %cst_30 {dimension_numbers = #tpu.dot_dimension_numbers<[1], [1], [0], [0], [0, 0, 1, 0], [], []>} : vector<8x128xbf16>, vector<8x128xbf16>, vector<8x8xf32> -> vector<8x8xf32>
    %cst_31 = arith.constant dense<0xFF800000> : vector<8xf32>
    %61 = vector.multi_reduction <maximumf>, %60, %cst_31 [1] : vector<8x8xf32> to vector<8xf32>
    %62 = vector.shape_cast %61 : vector<8xf32> to vector<8x1xf32>
    %63 = vector.broadcast %62 : vector<8x1xf32> to vector<8x8xf32>
    %64 = arith.subf %60, %63 : vector<8x8xf32>
    %65 = math.exp %64 : vector<8x8xf32>
    %cst_32 = arith.constant dense<0.000000e+00> : vector<8xf32>
    %66 = vector.multi_reduction <add>, %65, %cst_32 [1] : vector<8x8xf32> to vector<8xf32>
    %67 = vector.shape_cast %66 : vector<8xf32> to vector<8x1xf32>
    %cst_33 = arith.constant 0.000000e+00 : f32
    %68 = vector.broadcast %cst_33 : f32 to vector<8x128xf32>
    %69 = arith.select %56, %22, %68 : vector<8x128xi1>, vector<8x128xf32>
    %70 = arith.truncf %69 : vector<8x128xf32> to vector<8x128xbf16>
    %71 = arith.truncf %65 : vector<8x8xf32> to vector<8x8xbf16>
    %cst_34 = arith.constant dense<0.000000e+00> : vector<8x128xf32>
    %72 = tpu.matmul %71, %70, %cst_34 {dimension_numbers = #tpu.dot_dimension_numbers<[1], [0], [0], [1], [0, 0, 1, 1], [], []>} : vector<8x8xbf16>, vector<8x128xbf16>, vector<8x128xf32> -> vector<8x128xf32>
    %cst_35 = arith.constant 1.000000e+00 : f32
    %73 = vector.broadcast %cst_35 : f32 to vector<8x1xf32>
    %74 = arith.divf %73, %67 : vector<8x1xf32>
    %75 = vector.broadcast %74 : vector<8x1xf32> to vector<8x128xf32>
    %76 = arith.mulf %72, %75 : vector<8x128xf32>
    %77 = arith.addf %51, %76 : vector<8x128xf32>
    %c32_i32_36 = arith.constant 32 : i32
    %78 = vector.broadcast %c32_i32_36 : i32 to vector<8x128xi32>
    %79 = arith.cmpi sge, %24, %78 : vector<8x128xi32>
    %c48_i32 = arith.constant 48 : i32
    %80 = vector.broadcast %c48_i32 : i32 to vector<8x128xi32>
    %81 = arith.cmpi slt, %24, %80 : vector<8x128xi32>
    %82 = arith.andi %79, %81 : vector<8x128xi1>
    %cst_37 = arith.constant 0.000000e+00 : f32
    %83 = vector.broadcast %cst_37 : f32 to vector<8x128xf32>
    %84 = arith.select %82, %8, %83 : vector<8x128xi1>, vector<8x128xf32>
    %85 = arith.truncf %84 : vector<8x128xf32> to vector<8x128xbf16>
    %cst_38 = arith.constant dense<0.000000e+00> : vector<8x8xf32>
    %86 = tpu.matmul %85, %23, %cst_38 {dimension_numbers = #tpu.dot_dimension_numbers<[1], [1], [0], [0], [0, 0, 1, 0], [], []>} : vector<8x128xbf16>, vector<8x128xbf16>, vector<8x8xf32> -> vector<8x8xf32>
    %cst_39 = arith.constant dense<0xFF800000> : vector<8xf32>
    %87 = vector.multi_reduction <maximumf>, %86, %cst_39 [1] : vector<8x8xf32> to vector<8xf32>
    %88 = vector.shape_cast %87 : vector<8xf32> to vector<8x1xf32>
    %89 = vector.broadcast %88 : vector<8x1xf32> to vector<8x8xf32>
    %90 = arith.subf %86, %89 : vector<8x8xf32>
    %91 = math.exp %90 : vector<8x8xf32>
    %cst_40 = arith.constant dense<0.000000e+00> : vector<8xf32>
    %92 = vector.multi_reduction <add>, %91, %cst_40 [1] : vector<8x8xf32> to vector<8xf32>
    %93 = vector.shape_cast %92 : vector<8xf32> to vector<8x1xf32>
    %cst_41 = arith.constant 0.000000e+00 : f32
    %94 = vector.broadcast %cst_41 : f32 to vector<8x128xf32>
    %95 = arith.select %82, %22, %94 : vector<8x128xi1>, vector<8x128xf32>
    %96 = arith.truncf %95 : vector<8x128xf32> to vector<8x128xbf16>
    %97 = arith.truncf %91 : vector<8x8xf32> to vector<8x8xbf16>
    %cst_42 = arith.constant dense<0.000000e+00> : vector<8x128xf32>
    %98 = tpu.matmul %97, %96, %cst_42 {dimension_numbers = #tpu.dot_dimension_numbers<[1], [0], [0], [1], [0, 0, 1, 1], [], []>} : vector<8x8xbf16>, vector<8x128xbf16>, vector<8x128xf32> -> vector<8x128xf32>
    %cst_43 = arith.constant 1.000000e+00 : f32
    %99 = vector.broadcast %cst_43 : f32 to vector<8x1xf32>
    %100 = arith.divf %99, %93 : vector<8x1xf32>
    %101 = vector.broadcast %100 : vector<8x1xf32> to vector<8x128xf32>
    %102 = arith.mulf %98, %101 : vector<8x128xf32>
    %103 = arith.addf %77, %102 : vector<8x128xf32>
    %104 = arith.truncf %103 : vector<8x128xf32> to vector<8x128xbf16>
    %c0_44 = arith.constant 0 : index
    %c0_45 = arith.constant 0 : index
    %105 = vector.load %arg4[%c0_44, %c0_45] : memref<128x128xbf16, #tpu.memory_space<vmem>>, vector<128x128xbf16>
    %cst_46 = arith.constant dense<0.000000e+00> : vector<8x128xf32>
    %106 = tpu.matmul %104, %105, %cst_46 {dimension_numbers = #tpu.dot_dimension_numbers<[1], [0], [0], [1], [0, 0, 1, 1], [], []>} : vector<8x128xbf16>, vector<128x128xbf16>, vector<8x128xf32> -> vector<8x128xf32>
    %c0_47 = arith.constant 0 : index
    %c0_48 = arith.constant 0 : index
    %107 = vector.load %arg5[%c0_47, %c0_48] : memref<1x128xf32, #tpu.memory_space<vmem>>, vector<1x128xf32>
    %108 = vector.broadcast %107 : vector<1x128xf32> to vector<8x128xf32>
    %109 = arith.addf %106, %108 : vector<8x128xf32>
    %c0_49 = arith.constant 0 : index
    %c0_50 = arith.constant 0 : index
    %c0_51 = arith.constant 0 : index
    %110 = vector.load %arg6[%c0_49, %c0_50, %c0_51] : memref<1x8x128xf32, #tpu.memory_space<vmem>>, vector<1x8x128xf32>
    %111 = vector.shape_cast %110 : vector<1x8x128xf32> to vector<8x128xf32>
    %112 = vector.shape_cast %109 : vector<8x128xf32> to vector<1x8x128xf32>
    tpu.vector_store %arg6[%c0_49, %c0_50, %c0_51], %112 {strides = array<i32>} : memref<1x8x128xf32, #tpu.memory_space<vmem>>, vector<1x8x128xf32>,
    return
  }
  func.func @transform_0(%arg0: i32) -> (i32, i32, i32) {
    %c0_i32 = arith.constant 0 : i32
    %c0_i32_0 = arith.constant 0 : i32
    %c0_i32_1 = arith.constant 0 : i32
    return %arg0, %c0_i32, %c0_i32_0 : i32, i32, i32
  }
  func.func @transform_1(%arg0: i32) -> (i32, i32, i32) {
    %c0_i32 = arith.constant 0 : i32
    %c0_i32_0 = arith.constant 0 : i32
    %c0_i32_1 = arith.constant 0 : i32
    %c0_i32_2 = arith.constant 0 : i32
    return %c0_i32, %c0_i32_0, %c0_i32_1 : i32, i32, i32
  }
  func.func @transform_2(%arg0: i32) -> (i32, i32, i32) {
    %c0_i32 = arith.constant 0 : i32
    %c0_i32_0 = arith.constant 0 : i32
    %c0_i32_1 = arith.constant 0 : i32
    %c0_i32_2 = arith.constant 0 : i32
    return %c0_i32, %c0_i32_0, %c0_i32_1 : i32, i32, i32
  }
  func.func @transform_3(%arg0: i32) -> (i32, i32) {
    %c0_i32 = arith.constant 0 : i32
    %c0_i32_0 = arith.constant 0 : i32
    %c0_i32_1 = arith.constant 0 : i32
    return %c0_i32, %c0_i32_0 : i32, i32
  }
  func.func @transform_4(%arg0: i32) -> (i32, i32) {
    %c0_i32 = arith.constant 0 : i32
    %c0_i32_0 = arith.constant 0 : i32
    %c0_i32_1 = arith.constant 0 : i32
    return %c0_i32, %c0_i32_0 : i32, i32
  }
  func.func @transform_5(%arg0: i32) -> (i32, i32, i32) {
    %c0_i32 = arith.constant 0 : i32
    %c0_i32_0 = arith.constant 0 : i32
    %c0_i32_1 = arith.constant 0 : i32
    return %arg0, %c0_i32, %c0_i32_0 : i32, i32, i32
  }
}

</mosaic_0001>

<bundles_post_ra>
// kernel: tpu_custom_call.1
= control target key start
LH: loop header
LB: loop body
LE: loop exit
PB: predicated region body
PF: predicated region fallthrough
CT: control target
= control target key end

     0   :  { %10 = vsyncpa [#allocation3], 0  ;;  %s1977_s0 = inlined_call_operand.hbm [shape: bf16[2,8,128], index: 0, kind: input, shape index: {}]   ;;  %s1978_s1 = inlined_call_operand.hbm [shape: bf16[3,128,128], index: 1, kind: input, shape index: {}]   ;;  %s1979_s2 = inlined_call_operand.vmem [shape: f32[3,1,128], index: 2, kind: input, shape index: {}]   ;;  %s1980_s3 = inlined_call_operand.hbm [shape: bf16[128,128], index: 3, kind: input, shape index: {}]   ;;  %s1981_s4 = inlined_call_operand.vmem [shape: f32[1,128], index: 4, kind: input, shape index: {}]   ;;  %s1982_s5 = inlined_call_operand.hbm [shape: f32[2,8,128], index: 5, kind: output, shape index: {}]  }
   0x1   :  { %12 = vsyncpa [#allocation3 + $0x1], 0 }
   0x2   :  { %13 = vsyncpa [#allocation6], 0 }
   0x3   :  { %14 = vsyncpa [#allocation4], 0 }
   0x4   :  { %16 = vsyncpa [#allocation4 + $0x1], 0  ;;  %s1683_s18 = smov 0   ;;  %s1685_s19 = smov 0  }
   0x5   :  { %s1687_s20 = smov 0   ;;  %s1689_s21 = smov 0  }
   0x6 LB: > { %s1704_s22 = sadd.s32 4294967295, %s1643_s21   ;;  %s1150_s23 = sadd.s32 4294967294, %s1643_s21   ;;  %s1643_s21 = sphi %s1689_s21, %s2008_s21   ;;  %s1639_s20 = sphi %s1687_s20, %s2007_s20   ;;  %s1635_s19 = sphi %s1685_s19, %s2006_s19   ;;  %s1631_s18 = sphi %s1683_s18, %s2005_s18  }
   0x7   : > { %p42_p0 = scmp.ne.s32.totalorder %s1635_s19, %s1631_s18  ;;  %p1983_p1 = scmp.eq.s32.totalorder %s1704_s22, 0 }
   0x8   : > { %p156_p3 = scmp.eq.s32.totalorder %s1150_s23, 1  ;;  %p1151_p5 = scmp.ge.s32.totalorder %s1643_s21, 1 }
   0x9   : > { %p1713_p4 = por %p1983_p1, %p42_p0  ;;  %p163_p7 = scmp.lt.s32.totalorder %s1643_s21, 3 }
   0xa   : > { %p1718_p6 = por %p156_p3, %p42_p0  ;;  %s1645_s27 = smov [#allocation5]  }
   0xb   : > { %s1987_s24 = scalar_select %p1713_p4, 1, 0 }
   0xc   : > { %s1988_s25 = scalar_select %p1718_p6, 1, 0 }
   0xd   : > { %p1723_p8 = pnand %p1151_p5, %p163_p7  ;;  %s175_s28 = sshll.u32 %s1645_s27, 4  ;;  %s176_s28 = int_to_ptr.vmem [resolvable:$true] %s175_s28 }
   0xe   : > { %s1646_s30 = smov [#allocation7]   ;;  %s1506_s7 = scalar_lea.vmem %s176_s28, 3072 }
   0xf   : > { %s1989_s26 = scalar_select %p1723_p8, 1, 0 }
  0x10   : > { %p1392_p9 = pneg %p1723_p8  ;;  %s191_s6 = sshll.u32 %s1646_s30, 4  ;;  %s192_s6 = int_to_ptr.vmem [resolvable:$true] %s191_s6 }
  0x11   : > { %p1507_p13 = scmp.ne.s32.totalorder %s176_s28, %s1506_s7  ;;  %p1514_p5 = scmp.lt.s32.totalorder %s176_s28, %s176_s28 }
  0x12   : > { %p1732_p11 = pnand %p1392_p9, %p1983_p1  ;;  %p1515_p7 = scmp.lt.s32.totalorder %s1506_s7, %s1506_s7 }
  0x14   : > { %p1497_p12 = pneg %p1732_p11  ;;  %p1516_p10 = por %p1515_p7, %p1514_p5 }
  0x16   : > { %p1509_p0 = pnand %p1507_p13, %p1497_p12 }
  0x18   : > { %p1510_p3 = pneg %p1509_p0 }
  0x1a   : > { %p1517_p9 = pnand %p1516_p10, %p1510_p3 }
  0x1c   : > { %1520 = shalt.err (!%p1517_p9)
}
  0x1d   : > { %s1647_s8 = smov 64   ;;  %s1648_s9 = smov 4  }
  0x1e   : > { %1395 = dma.hbm_to_vmem [thread:$0]  (!%p1732_p11), %s1978_s1, 3072, %s176_s28, [#allocation6], %s1647_s8, %s1647_s8, %s1648_s9  }
  0x1f   : > { %s1532_s12 = scalar_lea.vmem %s192_s6, 1024  ;;  %p1540_p2 = scmp.lt.s32.totalorder %s192_s6, %s192_s6 }
  0x20   : > { %p1533_p1 = scmp.ne.s32.totalorder %s192_s6, %s1532_s12  ;;  %p1541_p6 = scmp.lt.s32.totalorder %s1532_s12, %s1532_s12 }
  0x22   : > { %p1535_p13 = pnand %p1533_p1, %p1497_p12  ;;  %p1542_p5 = por %p1541_p6, %p1540_p2 }
  0x24   : > { %p1536_p0 = pneg %p1535_p13 }
  0x26   : > { %p1543_p10 = pnand %p1542_p5, %p1536_p0 }
  0x28   : > { %1546 = shalt.err (!%p1543_p10)
}
  0x29   : > { %1398 = dma.hbm_to_vmem [thread:$0]  (!%p1732_p11), %s1980_s3, 1024, %s192_s6, [#allocation6], %s1647_s8, %s1647_s8, %s1648_s9  }
  0x2a   : > { %s1755_s15 = sadd.s32 1, %s1643_s21   ;;  %s29_s16 = sadd.s32 1, %s1639_s20 }
  0x2b   : > { %s26_s17 = ssub.s32 %s1643_s21, %s1755_s15  ;;  %p36_p1 = scmp.ne.s32.totalorder %s1639_s20, %s1635_s19 }
  0x2c   : > { %p27_p2 = scmp.eq.s32.totalorder %s26_s17, 0  ;;  %p37_p6 = scmp.eq.s32.totalorder %s1643_s21, 0 }
  0x2d   : > { %p1991_p12 = scmp.eq.s32.totalorder %s1704_s22, 1  ;;  %p1409_p7 = scmp.lt.s32.totalorder %s1643_s21, 2 }
  0x2e   : > { %s1771_s27 = scalar_select %p27_p2, %s1639_s20, %s29_s16  }
  0x2f   : > { %p1765_p3 = por %p1991_p12, %p36_p1  ;;  %p38_p9 = por %p37_p6, %p36_p1 }
  0x30   : > { %s208_s28 = sand.u32 1, %s1639_s20   ;;  %s1156_s30 = sshll.u32 %s1643_s21, 6 }
  0x31   : > { %s1992_s23 = scalar_select %p1765_p3, 1, 0 }
  0x32   : > { %s1155_s29 = sshll.u32 %s208_s28, 2  ;;  %s1778_s8 = scalar_lea.hbm %s1977_s0, %s1156_s30 }
  0x33   : > { %s212_s9 = scalar_lea.vmem [#allocation2], %s1155_s29  ;;  %p1780_p11 = pnand %p1409_p7, %p38_p9 }
  0x34   : > { %s219_s10 = sshll.u32 %s212_s9, 4  ;;  %s209_s12 = scalar_lea.sflag [#allocation3], %s208_s28  ;;  %s220_s10 = int_to_ptr.vmem [resolvable:$true] %s219_s10 }
  0x35   : > { %s1547_s13 = scalar_lea.hbm %s1778_s8, 64  ;;  %p1549_p0 = pneg %p1780_p11 }
  0x36   : > { %p1548_p13 = scmp.ne.s32.totalorder %s1778_s8, %s1547_s13  ;;  %s1552_s17 = scalar_lea.hbm %s1977_s0, 128 }
  0x37   : > { %p1553_p1 = scmp.lt.s32.totalorder %s1778_s8, %s1977_s0  ;;  %p1554_p2 = scmp.lt.s32.totalorder %s1552_s17, %s1547_s13 }
  0x38   : > { %p1550_p5 = pnand %p1549_p0, %p1548_p13 }
  0x39   : > { %p1555_p6 = por %p1554_p2, %p1553_p1 }
  0x3a   : > { %p1551_p10 = pneg %p1550_p5 }
  0x3c   : > { %p1556_p12 = pnand %p1555_p6, %p1551_p10 }
  0x3e   : > { %1559 = shalt.err (!%p1556_p12)
}
  0x3f   : > { %s1560_s6 = scalar_lea.vmem %s220_s10, 64  ;;  %s1649_s28 = smov [#allocation2]  }
  0x40   : > { %p1561_p7 = scmp.ne.s32.totalorder %s220_s10, %s1560_s6  ;;  %s1565_s7 = sshll.u32 %s1649_s28, 4  ;;  %s1566_s7 = int_to_ptr.vmem [resolvable:$false] %s1565_s7 }
  0x41   : > { %s1567_s9 = scalar_lea.vmem %s1566_s7, 128  ;;  %p1568_p13 = scmp.lt.s32.totalorder %s220_s10, %s1566_s7 }
  0x42   : > { %p1563_p9 = pnand %p1561_p7, %p1549_p0  ;;  %p1569_p5 = scmp.lt.s32.totalorder %s1567_s9, %s1560_s6 }
  0x44   : > { %p1564_p3 = pneg %p1563_p9  ;;  %p1570_p4 = por %p1569_p5, %p1568_p13 }
  0x46   : > { %p1571_p8 = pnand %p1570_p4, %p1564_p3 }
  0x48   : > { %1574 = shalt.err (!%p1571_p8)
}
  0x49   : > { %1402 = dma.hbm_to_vmem [thread:$0]  (!%p1780_p11), %s1778_s8, 64, %s220_s10, %s209_s12  }
  0x4a   : > { %p1994_p10 = scmp.ne.s32.totalorder %s1989_s26, 0 }
  0x4b   : > { %s1801_s13 = sand.u32 (!%p1994_p10), 1, %s1635_s19   ;;  %p1995_p0 = scmp.ne.s32.totalorder (!%p1994_p10), %s1987_s24, 0 }
  0x4c   : > { %228 = sbr.rel (%p1994_p10) target bundleno = 1803 (0x70b), region = 40  ;;  %s1158_s14 = sshll.u32 (!%p1994_p10), %s1801_s13, 2 }
  0x4d   : > { %s231_s16 = scalar_lea.sflag (!%p1994_p10), [#allocation3], %s1801_s13  ;;  %s1805_s17 = scalar_lea.vmem (!%p1994_p10), [#allocation2], %s1158_s14 }
  0x51   : > { %1618 = dma.done.wait (%p1995_p0), %s231_s16, 64  }
  0x52   : > { %1620 = vsyncadd (%p1995_p0), %s231_s16, 4294967232  ;;  %p1996_p4 = scmp.eq.s32.totalorder %s1704_s22, 0 }
  0x54   : > { %1622 = dma.done.wait (%p1996_p4), [#allocation6], 4096   ;;  %p1997_p8 = pmov %p1996_p4 }
  0x55   : > { %v1650_v0 = vmov 0.0   ;;  %vm1651_vm0 = vmmov 0   ;;  %v1451_v1 = vld [vmem:[#allocation5 + $0x78] sm:$0xff]   ;;  %v1453_v3 = vld [vmem:[#allocation5 + $0x70] sm:$0xff]   ;;  %v1455_v5 = vld [vmem:[#allocation5 + $0x68] sm:$0xff]   ;;  %v609_v27 = vlaneseq  ;;  %vm656_vm3 = vcmask 64512  }
  0x56   : > { %1624 = vsyncadd (%p1997_p8), [#allocation6], 4294963200  ;;  %1284 = vmatprep.subr.bf16.mxu1 %v1650_v0  ;;  %1264 = vmatprep.subr.bf16.mxu0 %v1650_v0  ;;  %v1452_v2 = vld [vmem:[#allocation5 + $0x38] sm:$0xff]   ;;  %v1454_v4 = vld [vmem:[#allocation5 + $0x30] sm:$0xff]   ;;  %vm672_vm10 = vcmask 1043456   ;;  %s1161_s30 = sshll.u32 %s1801_s13, 3 }
  0x57   : > { %1300 = vmatprep.mubr.msk.bf16.mxu1 %vm1651_vm0, %v1650_v0  ;;  %1280 = vmatprep.mubr.msk.bf16.mxu0 %vm1651_vm0, %v1650_v0  ;;  %v1456_v6 = vld [vmem:[#allocation5 + $0x28] sm:$0xff]   ;;  %v1457_v7 = vld [vmem:[#allocation5 + $0x60] sm:$0xff]   ;;  %v1459_v9 = vld [vmem:[#allocation5 + $0x58] sm:$0xff]   ;;  %v610_v33 = vand.u32 127, %v609_v27  ;;  %s1213_s28 = sshll.u32 %s1704_s22, 7  ;;  %s268_s7 = scalar_lea.vmem [#allocation8], %s1161_s30 }
  0x58   : > { %1285 = vmatpush3.bf16.msra.mxu1 %v1451_v1  ;;  %1265 = vmatpush3.bf16.msra.mxu0 %v1452_v2  ;;  %v1458_v8 = vld [vmem:[#allocation5 + $0x20] sm:$0xff]   ;;  %v1460_v10 = vld [vmem:[#allocation5 + $0x18] sm:$0xff]   ;;  %v1461_v11 = vld [vmem:[#allocation5 + $0x50] sm:$0xff]   ;;  %s1061_s9 = sshll.u32 %s268_s7, 4  ;;  %s1048_s24 = scalar_lea.sflag [#allocation4], %s1801_s13  ;;  %s1936_s9 = int_to_ptr.vmem [resolvable:$true] %s1061_s9 }
  0x59   : > { %1286 = vmatprep.subr.bf16.mxu1 %v1650_v0  ;;  %1266 = vmatprep.subr.bf16.mxu0 %v1650_v0  ;;  %v1462_v12 = vld [vmem:[#allocation5 + $0x10] sm:$0xff]   ;;  %v1463_v13 = vld [vmem:[#allocation5 + $0x48] sm:$0xff]   ;;  %v1465_v15 = vld [vmem:[#allocation5 + $0x40] sm:$0xff]   ;;  %vm612_vm1 = vcmp.lt.s32.totalorder %v610_v33, 16  ;;  %vm720_vm4 = vcmp.ge.s32.totalorder %v610_v33, 16  ;;  %vm721_vm5 = vcmp.lt.s32.totalorder %v610_v33, 32 }
  0x5a   : > { %v1464_v14 = vld [vmem:[#allocation5 + $0x8] sm:$0xff]   ;;  %v1466_v16 = vld [vmem:[#allocation5] sm:$0xff]   ;;  %v270_v17 = vld [vmem:[%s1805_s17] sm:$0xf]  ;;  %vm827_vm6 = vcmp.ge.s32.totalorder %v610_v33, 32  ;;  %vm828_vm7 = vcmp.lt.s32.totalorder %v610_v33, 48  ;;  %s1934_s17 = scalar_lea.hbm %s1982_s5, %s1213_s28 }
  0x5b   : > { %v1467_v18 = vld [vmem:[#allocation5 + $0xb8] sm:$0xff]   ;;  %v1468_v19 = vld [vmem:[#allocation5 + $0xb0] sm:$0xff]   ;;  %v1469_v20 = vld [vmem:[#allocation5 + $0xa8] sm:$0xff]   ;;  %s1575_s26 = scalar_lea.vmem %s1936_s9, 128  ;;  %p2002_p11 = scmp.ne.s32.totalorder %s1992_s23, 0 }
  0x5c   : > { %1287 = vmatpush3.bf16.msra.mxu1 %v1453_v3  ;;  %1267 = vmatpush3.bf16.msra.mxu0 %v1454_v4  ;;  %v1470_v21 = vld [vmem:[#allocation5 + $0xa0] sm:$0xff]   ;;  %v1471_v22 = vld [vmem:[#allocation5 + $0x98] sm:$0xff]   ;;  %v1472_v23 = vld [vmem:[#allocation5 + $0x90] sm:$0xff]   ;;  %p1576_p3 = scmp.ne.s32.totalorder %s1936_s9, %s1575_s26  ;;  %s1652_s22 = smov [#allocation8]  }
  0x5d   : > { %1288 = vmatprep.subr.bf16.mxu1 %v1650_v0  ;;  %1268 = vmatprep.subr.bf16.mxu0 %v1650_v0  ;;  %v1473_v24 = vld [vmem:[#allocation5 + $0x88] sm:$0xff]   ;;  %v1474_v25 = vld [vmem:[#allocation5 + $0x80] sm:$0xff]   ;;  %v1172_v26 = vld [vmem:[%s1979_s2 + $0x1] ss:$0 sm:$0xff]  ;;  %s1579_s8 = sshll.u32 %s1652_s22, 4  ;;  %s1580_s8 = int_to_ptr.vmem [resolvable:$false] %s1579_s8 }
  0x5e   : > { %v1162_v30 = vld [vmem:[%s1979_s2] ss:$0 sm:$0xff]  ;;  %vm1191_vm2 = vmpackc.low %vm612_vm1, %vm612_vm1  ;;  %v1182_v47 = vld [vmem:[%s1979_s2 + $0x2] ss:$0 sm:$0xff]  ;;  %p1577_p1 = pnand %p1576_p3, %p2002_p11  ;;  %s1581_s10 = scalar_lea.vmem %s1580_s8, 256 }
  0x5f   : > { %vm1873_vm8 = vmand %vm720_vm4, %vm721_vm5  ;;  %p1582_p6 = scmp.lt.s32.totalorder %s1936_s9, %s1580_s8  ;;  %p1583_p12 = scmp.lt.s32.totalorder %s1581_s10, %s1575_s26 }
  0x60   : > { %1289 = vmatpush3.bf16.msra.mxu1 %v1455_v5  ;;  %1269 = vmatpush3.bf16.msra.mxu0 %v1456_v6  ;;  %vm1878_vm9 = vmand %vm827_vm6, %vm828_vm7  ;;  %p1578_p2 = pneg %p1577_p1 }
  0x61   : > { %1290 = vmatprep.subr.bf16.mxu1 %v1650_v0  ;;  %1270 = vmatprep.subr.bf16.mxu0 %v1650_v0  ;;  %vm1195_vm11 = vmpackc.low %vm1873_vm8, %vm1873_vm8  ;;  %p1584_p7 = por %p1583_p12, %p1582_p6 }
  0x62   : > { %vm1199_vm12 = vmpackc.low %vm1878_vm9, %vm1878_vm9 }
  0x63   : > { %p1585_p9 = pnand %p1584_p7, %p1578_p2 }
  0x64   : > { %1291 = vmatpush3.bf16.msra.mxu1 %v1457_v7  ;;  %1271 = vmatpush3.bf16.msra.mxu0 %v1458_v8 }
  0x65   : > { %1292 = vmatprep.subr.bf16.mxu1 %v1650_v0  ;;  %1272 = vmatprep.subr.bf16.mxu0 %v1650_v0 }
  0x68   : > { %1293 = vmatpush3.bf16.msra.mxu1 %v1459_v9  ;;  %1273 = vmatpush3.bf16.msra.mxu0 %v1460_v10 }
  0x69   : > { %1294 = vmatprep.subr.bf16.mxu1 %v1650_v0  ;;  %1274 = vmatprep.subr.bf16.mxu0 %v1650_v0 }
  0x6c   : > { %1295 = vmatpush3.bf16.msra.mxu1 %v1461_v11  ;;  %1275 = vmatpush3.bf16.msra.mxu0 %v1462_v12 }
  0x6d   : > { %1296 = vmatprep.subr.bf16.mxu1 %v1650_v0  ;;  %1276 = vmatprep.subr.bf16.mxu0 %v1650_v0 }
  0x70   : > { %1297 = vmatpush3.bf16.msra.mxu1 %v1463_v13  ;;  %1277 = vmatpush3.bf16.msra.mxu0 %v1464_v14 }
  0x71   : > { %1298 = vmatprep.subr.bf16.mxu1 %v1650_v0  ;;  %1278 = vmatprep.subr.bf16.mxu0 %v1650_v0 }
  0x74   : > { %1299 = vmatpush3.bf16.msra.mxu1 %v1465_v15  ;;  %1279 = vmatpush3.bf16.msra.mxu0 %v1466_v16 }
  0x75   : > { %1324 = vmatprep.subr.bf16.mxu1 %v1650_v0  ;;  %1304 = vmatprep.subr.bf16.mxu0 %v1650_v0 }
  0x77   : > { %1301 = vmatmul.mubr.bf16.vlgmr.msra.gmra.mxu1 %v270_v17  ;;  %1281 = vmatmul.mubr.bf16.vlgmr.msra.gmra.mxu0 %v270_v17 }
  0x78   : > { %1326 = vmatprep.mubr.msk.bf16.mxu1 %vm1651_vm0, %v1650_v0  ;;  %1320 = vmatprep.mubr.msk.bf16.mxu0 %vm1651_vm0, %v1650_v0 }
  0x79   : > { %1305 = vmatpush3.bf16.msra.mxu0 %v1467_v18 }
  0x7a   : > { %1306 = vmatprep.subr.bf16.mxu0 %v1650_v0 }
  0x7d   : > { %1307 = vmatpush3.bf16.msra.mxu0 %v1468_v19 }
  0x7e   : > { %1308 = vmatprep.subr.bf16.mxu0 %v1650_v0 }
  0x81   : > { %1309 = vmatpush3.bf16.msra.mxu0 %v1469_v20 }
  0x82   : > { %1310 = vmatprep.subr.bf16.mxu0 %v1650_v0 }
  0x85   : > { %1311 = vmatpush3.bf16.msra.mxu0 %v1470_v21 }
  0x86   : > { %1312 = vmatprep.subr.bf16.mxu0 %v1650_v0 }
  0x89   : > { %1313 = vmatpush3.bf16.msra.mxu0 %v1471_v22 }
  0x8a   : > { %1314 = vmatprep.subr.bf16.mxu0 %v1650_v0 }
  0x8d   : > { %1315 = vmatpush3.bf16.msra.mxu0 %v1472_v23 }
  0x8e   : > { %1316 = vmatprep.subr.bf16.mxu0 %v1650_v0 }
  0x91   : > { %1317 = vmatpush3.bf16.msra.mxu0 %v1473_v24 }
  0x92   : > { %1318 = vmatprep.subr.bf16.mxu0 %v1650_v0 }
  0x95   : > { %1319 = vmatpush3.bf16.msra.mxu0 %v1474_v25 }
  0x96   : > { %1360 = vmatprep.subr.bf16.mxu0 %v1650_v0 }
  0x98   : > { %1321 = vmatmul.mubr.bf16.vlgmr.msra.gmra.mxu0 %v270_v17 }
  0x99   : > { %1376 = vmatprep.mubr.msk.bf16.mxu0 %vm1651_vm0, %v1650_v0 }
 0x137   : > { %v489_v28 = vpop.f32.mrf.mxu1  ;;  %v376_v31 = vpop.f32.mrf.mxu0 }
 0x138   : > { %v490_v29 = vadd.f32 %v1172_v26, %v489_v28  ;;  %v377_v36 = vadd.f32 %v1162_v30, %v376_v31 }
 0x139   : > { %v1302_v32 = vpop.f32.mrf.mxu1  ;;  %v1282_v35 = vpop.f32.mrf.mxu0 }
 0x13a   : > { %v1858_v34 = vpack.c.bf16 %v490_v29, %v490_v29  ;;  %v1862_v41 = vpack.c.bf16 %v377_v36, %v377_v36 }
 0x13b   : > { %v492_v37 = vpop.f32.mrf.mxu1  ;;  %v379_v38 = vpop.f32.mrf.mxu0 }
 0x13c   : > { %1325 = vmatpush3.bf16.xpose.msra.mxu1 %v1858_v34  ;;  %v1475_v37 = vld [vmem:[#allocation7 + $0x38] sm:$0xff]   ;;  %v1476_v38 = vld [vmem:[#allocation7 + $0x30] sm:$0xff]  }
 0x13d   : > { %v1303_v39 = vpop.f32.mrf.mxu1  ;;  %1330 = vmatprep.subr.bf16.mxu1 %v1650_v0  ;;  %v1283_v40 = vpop.f32.mrf.mxu0  ;;  %1361 = vmatpush3.bf16.msra.mxu0 %v1475_v37 }
 0x13e   : > { %1362 = vmatprep.subr.bf16.mxu0 %v1650_v0  ;;  %v1477_v39 = vld [vmem:[#allocation7 + $0x28] sm:$0xff]   ;;  %v1478_v40 = vld [vmem:[#allocation7 + $0x20] sm:$0xff]  }
 0x141   : > { %1363 = vmatpush3.bf16.msra.mxu0 %v1476_v38 }
 0x142   : > { %1364 = vmatprep.subr.bf16.mxu0 %v1650_v0 }
 0x143   : > { %1327 = vmatmul.mubr.msk.bf16.vlgmr.msra.gmra.mxu1 %vm1191_vm2, %v1862_v41 }
 0x144   : > { %1332 = vmatprep.mubr.msk.bf16.mxu1 %vm1651_vm0, %v1650_v0 }
 0x145   : > { %1365 = vmatpush3.bf16.msra.mxu0 %v1477_v39 }
 0x146   : > { %1366 = vmatprep.subr.bf16.mxu0 %v1650_v0 }
 0x149   : > { %1367 = vmatpush3.bf16.msra.mxu0 %v1478_v40 }
 0x14a   : > { %1368 = vmatprep.subr.bf16.mxu0 %v1650_v0 }
 0x158   : > { %v602_v48 = vpop.f32.mrf.mxu0 }
 0x159   : > { %v603_v49 = vadd.f32 %v1182_v47, %v602_v48 }
 0x15a   : > { %v1322_v51 = vpop.f32.mrf.mxu0 }
 0x15b   : > { %v666_v52 = vsel %vm612_vm1, %v603_v49, 0.0  ;;  %v774_v56 = vsel %vm1873_vm8, %v603_v49, 0.0  ;;  %v881_v57 = vsel %vm1878_vm9, %v603_v49, 0.0 }
 0x15c   : > { %v667_v54 = vpack.c.bf16 %v666_v52, %v666_v52  ;;  %v605_v55 = vpop.f32.mrf.mxu0  ;;  %v775_v60 = vpack.c.bf16 %v774_v56, %v774_v56  ;;  %v882_v61 = vpack.c.bf16 %v881_v57, %v881_v57 }
 0x15e   : > { %v1323_v58 = vpop.f32.mrf.mxu0  ;;  %v674_v59 = vsel %vm672_vm10, %v667_v54, 0  ;;  %v781_v62 = vsel %vm672_vm10, %v775_v60, 0  ;;  %v888_v63 = vsel %vm672_vm10, %v882_v61, 0  ;;  %v1203_v60 = vld [vmem:[%s1981_s4] ss:$0 sm:$0xff] }
 0x15f   : > { %1331 = vmatpush3.bf16.msra.mxu1 %v674_v59 }
 0x160   : > { %1336 = vmatprep.subr.bf16.mxu1 %v1650_v0 }
 0x203   : > { %v650_v42 = vpop.f32.mrf.mxu1 }
 0x204   : > { %v657_v43 = vsel %vm656_vm3, %v650_v42, -inf }
 0x205   : > { %658 = vmax.xlane.f32.xlu0 %v657_v43  ;;  %v1328_v44 = vpop.f32.mrf.mxu1  ;;  %v1481_v43 = vld [vmem:[#allocation7 + $0x8] sm:$0xff]  }
 0x206   : > { %v1482_v44 = vld [vmem:[#allocation7] sm:$0xff]  }
 0x207   : > { %v653_v45 = vpop.f32.mrf.mxu1 }
 0x209   : > { %v1329_v46 = vpop.f32.mrf.mxu1 }
 0x28e   : > { %v659_v1 = vpop.xlane.xlu0 %658 }
 0x28f   : > { %v660_v2 = vsub.f32 %v650_v42, %v659_v1  ;;  %v1480_v42 = vld [vmem:[#allocation7 + $0x10] sm:$0xff]  }
 0x291   : > { %v661_v3 = vmul.f32 1.442695, %v660_v2 }
 0x293   : > { %1483 = vpow2.f32 %v661_v3 }
 0x2a0   : > { %v1484_v4 = vpop.eup %1483 }
 0x2a1   : > { %v668_v5 = vpack.c.bf16 %v1484_v4, %v1484_v4  ;;  %v663_v29 = vsel %vm656_vm3, %v1484_v4, 0.0 }
 0x2a3   : > { %1333 = vmatmul.mubr.msk.bf16.vlgmr.msra.gmra.mxu1 %vm656_vm3, %v668_v5 }
 0x2a4   : > { %1337 = vmatpush3.bf16.xpose.msra.mxu1 %v1858_v34  ;;  %1338 = vmatprep.mubr.msk.bf16.mxu1 %vm1651_vm0, %v1650_v0 }
 0x2a5   : > { %1342 = vmatprep.subr.bf16.mxu1 %v1650_v0 }
 0x2ab   : > { %1339 = vmatmul.mubr.msk.bf16.vlgmr.msra.gmra.mxu1 %vm1195_vm11, %v1862_v41 }
 0x2ac   : > { %1343 = vmatpush3.bf16.msra.mxu1 %v781_v62  ;;  %1344 = vmatprep.mubr.msk.bf16.mxu1 %vm1651_vm0, %v1650_v0 }
 0x2ad   : > { %1348 = vmatprep.subr.bf16.mxu1 %v1650_v0 }
 0x363   : > { %v1899_v6 = vpop.f32.mrf.mxu1 }
 0x365   : > { %v1334_v7 = vpop.f32.mrf.mxu1 }
 0x367   : > { %v713_v8 = vpop.f32.mrf.mxu1 }
 0x369   : > { %v1335_v9 = vpop.f32.mrf.mxu1 }
 0x36b   : > { %v759_v10 = vpop.f32.mrf.mxu1 }
 0x36c   : > { %v765_v11 = vsel %vm656_vm3, %v759_v10, -inf }
 0x36d   : > { %766 = vmax.xlane.f32.xlu0 %v765_v11  ;;  %v1340_v12 = vpop.f32.mrf.mxu1 }
 0x36f   : > { %v762_v13 = vpop.f32.mrf.mxu1 }
 0x371   : > { %v1341_v14 = vpop.f32.mrf.mxu1 }
 0x3f6   : > { %v767_v15 = vpop.xlane.xlu0 %766 }
 0x3f7   : > { %v768_v16 = vsub.f32 %v759_v10, %v767_v15 }
 0x3f9   : > { %v769_v17 = vmul.f32 1.442695, %v768_v16 }
 0x3fb   : > { %1485 = vpow2.f32 %v769_v17 }
 0x408   : > { %v1486_v18 = vpop.eup %1485 }
 0x409   : > { %v771_v19 = vsel %vm656_vm3, %v1486_v18, 0.0  ;;  %v776_v20 = vpack.c.bf16 %v1486_v18, %v1486_v18 }
 0x40a   : > { %772 = vadd.xlane.f32.xlu0 %v771_v19 }
 0x40b   : > { %1345 = vmatmul.mubr.msk.bf16.vlgmr.msra.gmra.mxu1 %vm656_vm3, %v776_v20 }
 0x40c   : > { %1349 = vmatpush3.bf16.xpose.msra.mxu1 %v1858_v34  ;;  %1350 = vmatprep.mubr.msk.bf16.mxu1 %vm1651_vm0, %v1650_v0 }
 0x40d   : > { %1354 = vmatprep.subr.bf16.mxu1 %v1650_v0 }
 0x413   : > { %1351 = vmatmul.mubr.msk.bf16.vlgmr.msra.gmra.mxu1 %vm1199_vm12, %v1862_v41  ;;  %v1479_v41 = vld [vmem:[#allocation7 + $0x18] sm:$0xff]  }
 0x414   : > { %1355 = vmatpush3.bf16.msra.mxu1 %v888_v63  ;;  %1356 = vmatprep.mubr.msk.bf16.mxu1 %vm1651_vm0, %v1650_v0 }
 0x415   : > { %1369 = vmatpush3.bf16.msra.mxu0 %v1479_v41 }
 0x416   : > { %1370 = vmatprep.subr.bf16.mxu0 %v1650_v0 }
 0x419   : > { %1371 = vmatpush3.bf16.msra.mxu0 %v1480_v42 }
 0x41a   : > { %1372 = vmatprep.subr.bf16.mxu0 %v1650_v0 }
 0x41d   : > { %1373 = vmatpush3.bf16.msra.mxu0 %v1481_v43 }
 0x41e   : > { %1374 = vmatprep.subr.bf16.mxu0 %v1650_v0 }
 0x421   : > { %1375 = vmatpush3.bf16.msra.mxu0 %v1482_v44 }
 0x493   : > { %v773_v46 = vpop.xlane.xlu0 %772 }
 0x4cb   : > { %v817_v21 = vpop.f32.mrf.mxu1 }
 0x4cd   : > { %v1346_v22 = vpop.f32.mrf.mxu1 }
 0x4cf   : > { %v820_v23 = vpop.f32.mrf.mxu1 }
 0x4d1   : > { %v1347_v24 = vpop.f32.mrf.mxu1 }
 0x4d3   : > { %v866_v25 = vpop.f32.mrf.mxu1 }
 0x4d4   : > { %v872_v26 = vsel %vm656_vm3, %v866_v25, -inf }
 0x4d5   : > { %873 = vmax.xlane.f32.xlu1 %v872_v26  ;;  %v1352_v27 = vpop.f32.mrf.mxu1 }
 0x4d7   : > { %v869_v28 = vpop.f32.mrf.mxu1 }
 0x4d9   : > { %664 = vadd.xlane.f32.xlu1 %v663_v29  ;;  %v1353_v30 = vpop.f32.mrf.mxu1 }
 0x55e   : > { %v874_v31 = vpop.xlane.xlu1 %873 }
 0x55f   : > { %v875_v32 = vsub.f32 %v866_v25, %v874_v31 }
 0x561   : > { %v876_v33 = vmul.f32 1.442695, %v875_v32 }
 0x562   : > { %v665_v45 = vpop.xlane.xlu1 %664 }
 0x563   : > { %1487 = vpow2.f32 %v876_v33 }
 0x564   : > { %1489 = vrcp.f32 %v665_v45 }
 0x565   : > { %1491 = vrcp.f32 %v773_v46 }
 0x570   : > { %v1488_v34 = vpop.eup %1487 }
 0x571   : > { %v878_v35 = vsel %vm656_vm3, %v1488_v34, 0.0  ;;  %v883_v36 = vpack.c.bf16 %v1488_v34, %v1488_v34  ;;  %v1490_v48 = vpop.eup %1489 }
 0x572   : > { %879 = vadd.xlane.f32.xlu1 %v878_v35  ;;  %v718_v49 = vmul.f32 %v1490_v48, %v1899_v6  ;;  %v1492_v50 = vpop.eup %1491 }
 0x573   : > { %1357 = vmatmul.mubr.msk.bf16.vlgmr.msra.gmra.mxu1 %vm656_vm3, %v883_v36  ;;  %v825_v51 = vmul.f32 %v1492_v50, %v817_v21 }
 0x575   : > { %v826_v54 = vadd.f32 %v825_v51, %v718_v49 }
 0x5fb   : > { %v880_v47 = vpop.xlane.xlu1 %879 }
 0x5fc   : > { %1493 = vrcp.f32 %v880_v47 }
 0x609   : > { %v1494_v52 = vpop.eup %1493 }
 0x633   : > { %v924_v53 = vpop.f32.mrf.mxu1 }
 0x634   : > { %v932_v55 = vmul.f32 %v1494_v52, %v924_v53 }
 0x635   : > { %v1358_v0 = vpop.f32.mrf.mxu1 }
 0x636   : > { %v933_v56 = vadd.f32 %v932_v55, %v826_v54 }
 0x637   : > { %v927_v57 = vpop.f32.mrf.mxu1 }
 0x638   : > { %v934_v58 = vpack.c.bf16 %v933_v56, %v933_v56 }
 0x639   : > { %v1359_v59 = vpop.f32.mrf.mxu1 }
 0x63a   : > { %1377 = vmatmul.mubr.bf16.vlgmr.msra.gmra.mxu0 %v934_v58 }
 0x6fa   : > { %v1040_v61 = vpop.f32.mrf.mxu0 }
 0x6fb   : > { %v1041_v62 = vadd.f32 %v1203_v60, %v1040_v61 }
 0x6fc   : > { %v1378_v63 = vpop.f32.mrf.mxu0 }
 0x6fd   : > { %1046 = vst [vmem:[%s268_s7] sm:$0xff] %v1041_v62 }
 0x6fe   : > { %v1043_v1 = vpop.f32.mrf.mxu0 }
 0x6ff   : > { %1588 = shalt.err (!%p1585_p9)
}
 0x700   : > { %s1589_s11 = scalar_lea.hbm %s1934_s17, 128  ;;  %s1593_s30 = scalar_lea.hbm %s1982_s5, 256 }
 0x701   : > { %p1590_p13 = scmp.ne.s32.totalorder %s1934_s17, %s1589_s11  ;;  %p1594_p0 = scmp.lt.s32.totalorder %s1934_s17, %s1982_s5 }
 0x702   : > { %p1595_p4 = scmp.lt.s32.totalorder %s1593_s30, %s1589_s11 }
 0x703   : > { %p1591_p5 = pnand %p1590_p13, %p2002_p11 }
 0x704   : > { %p1596_p8 = por %p1595_p4, %p1594_p0 }
 0x705   : > { %p1592_p10 = pneg %p1591_p5 }
 0x707   : > { %p1597_p3 = pnand %p1596_p8, %p1592_p10 }
 0x709   : > { %1600 = shalt.err (!%p1597_p3)
}
 0x70a   : > { %1390 = dma.vmem_to_hbm [thread:$0]  (%p2002_p11), %s1936_s9, 128, %s1934_s17, %s1048_s24   ;;  %v1379_v2 = vpop.f32.mrf.mxu0 }
 0x70b PF: > { %s1073_s28 = sand.u32 1, %s1631_s18   ;;  %p2003_p1 = scmp.ne.s32.totalorder %s1988_s25, 0 }
 0x70c   : > { %p2004_p2 = scmp.ge.s32.totalorder %s1643_s21, 2  ;;  %s1074_s7 = scalar_lea.sflag [#allocation4], %s1073_s28 }
 0x70e   : > { %p1404_p6 = pnand %p2004_p2, %p2003_p1 }
 0x710   : > { %p1405_p12 = pneg %p1404_p6 }
 0x712   : > { %1626 = dma.done.wait (%p1405_p12), %s1074_s7, 128  }
 0x713   : > { %1628 = vsyncadd (%p1405_p12), %s1074_s7, 4294967168  ;;  %p19_p7 = scmp.ge.s32.totalorder %s1755_s15, 4   ;;  %s2005_s18 = smov %s1635_s19 }
 0x714   : > { %s2006_s19 = smov %s1639_s20  ;;  %s2007_s20 = smov %s1771_s27 }
 0x715   : > { %s2008_s21 = smov %s1755_s15  ;;  %21 = sbr.rel (!%p19_p7) target bundleno = 6 (0x6), region = 97 }
 0x71a   :  { %1079 = vsyncpa [#allocation3], 1 }
 0x71b   :  { %1081 = vsyncpa [#allocation3 + $0x1], 1 }
 0x71c   :  { %1082 = vsyncpa [#allocation6], 1 }
 0x71d   :  { %1083 = vsyncpa [#allocation4], 1 }
 0x71e   :  { %1085 = vsyncpa [#allocation4 + $0x1], 1 }

</bundles_post_ra>
